<compile_context>
chip_gen: v7x
topology: tpu7x:2x2x1
jax: 0.10.0
libtpu: 0.0.40
codegen_flags: <defaults>
</compile_context>

<pallas_src>
import functools

import jax
import jax.numpy as jnp
from jax import lax
from jax.experimental import pallas as pl
from jax.experimental.pallas import tpu as pltpu


# -----------------------------------------------------------------------------
# pltpu.roll direction probe (runs once, eagerly, at kernel-build time).  The
# kernel needs result[:, s] = x[:, (s + d) % n]; detect the rotation
# convention with a tiny kernel so the tap-shift sign stays correct across
# JAX versions.
# -----------------------------------------------------------------------------
def _roll_probe_kernel(x_ref, o_ref):
    o_ref[...] = pltpu.roll(x_ref[...], 1, 1)


@functools.lru_cache(maxsize=None)
def _roll_matches_jnp_roll():
    n = 256
    x = lax.broadcasted_iota(jnp.float32, (8, n), 1)
    out = pl.pallas_call(
        _roll_probe_kernel,
        out_shape=jax.ShapeDtypeStruct((8, n), jnp.float32),
    )(x)
    v = float(out[0, 0])
    if v == float(n - 1):
        return True      # jnp.roll convention: result[i] = x[(i - shift) % n]
    if v == 1.0:
        return False     # rotate-left convention: result[i] = x[(i + shift) % n]
    raise RuntimeError("unexpected pltpu.roll behaviour")


def _pick_block_batch(n, max_nb=8):
    """Largest divisor of n (<= max_nb) keeping >= 2 grid steps when possible."""
    cands = [nb for nb in range(1, min(n, max_nb) + 1)
             if n % nb == 0 and n // nb >= 2]
    return max(cands) if cands else min(n, max_nb)


def basic_block(x_nchw, w1, bn1, w2, bn2, eps=1e-5):
    """BasicBlock forward (stride=1, downsample=None). x_nchw: (N, C, H, W)."""
    N, Cin, H, W = x_nchw.shape
    Cout = w1.shape[0]
    assert Cin == Cout, "downsample=None requires inplanes == planes"
    HW = H * W
    # The lane-dense roll/mask im2col assumes un-padded lanes/sublanes.
    assert HW % 128 == 0 and Cin % 8 == 0, "shape would hit lane/sublane padding"

    Nb = _pick_block_batch(N)
    assert N % Nb == 0

    # NCHW flattens to the lane-dense (N, C, H*W) layout for free (no copy).
    x = x_nchw.reshape(N, Cin, HW).astype(jnp.float32)

    def fold_bn(p):
        gamma, beta, mean, var = p
        scale = gamma / jnp.sqrt(var + eps)
        bias = beta - mean * scale
        return (scale.reshape(-1, 1).astype(jnp.float32),
                bias.reshape(-1, 1).astype(jnp.float32))

    s1, b1 = fold_bn(bn1)
    s2, b2 = fold_bn(bn2)

    def to_mat(w, scale):
        # (Cout, Cin, 3, 3) -> (Cout, 9*Cin); column = (ky*3 + kx)*Cin + cin.
        # BN scale is per-output-channel, so it folds into the weight rows.
        co, ci = w.shape[0], w.shape[1]
        m = jnp.transpose(w, (0, 2, 3, 1)).reshape(co, 9 * ci).astype(jnp.float32)
        return (m * scale).astype(jnp.bfloat16)

    w1m, w2m = to_mat(w1, s1), to_mat(w2, s2)

    jnp_roll = _roll_matches_jnp_roll()

    def tap_shift(d):
        # pltpu.roll shift such that result[:, s] = a[:, (s + d) % HW]
        return (-d) % HW if jnp_roll else d % HW

    # Static tap order = (ky, kx) row-major, matching to_mat() column order.
    taps = [(dy, dx, dy * W + dx) for dy in (-1, 0, 1) for dx in (-1, 0, 1)]

    # Host-side precomputed boundary mask for the full (9*Cin, HW) im2col slab.
    s = jnp.arange(HW)
    r, c = s // W, s % W
    mask_rows = []
    for dy, dx, _ in taps:
        valid = ((r + dy >= 0) & (r + dy < H) & (c + dx >= 0) & (c + dx < W))
        mask_rows.append(jnp.tile(valid.astype(jnp.float32)[None, :], (Cin, 1)))
    mask = jnp.concatenate(mask_rows, axis=0)          # (9*Cin, HW)

    def kernel(x_ref, mask_ref, w1_ref, b1_ref, w2_ref, b2_ref, out_ref,
               rhs_ref, mid_ref):
        def build_rhs(a, i):
            # a: (C, HW) f32 lane-dense per-image tile.  9 XLU lane rolls,
            # one precomputed-mask multiply, one bf16 cast into the wide RHS.
            parts = []
            for (dy, dx, d) in taps:
                parts.append(a if d == 0 else pltpu.roll(a, tap_shift(d), 1))
            slab = jnp.concatenate(parts, axis=0) * mask_ref[...]   # (9C, HW)
            rhs_ref[:, i * HW:(i + 1) * HW] = slab.astype(jnp.bfloat16)

        # conv1 (bn1 scale folded into weights) -> bias -> relu, all Nb images
        for i in range(Nb):
            build_rhs(x_ref[i], i)
        y1 = jnp.dot(w1_ref[...], rhs_ref[...],
                     preferred_element_type=jnp.float32)            # (Co, Nb*HW)
        mid_ref[...] = jnp.maximum(y1 + b1_ref[...], 0.0)

        # conv2 (bn2 scale folded) -> bias
        for i in range(Nb):
            build_rhs(mid_ref[:, i * HW:(i + 1) * HW], i)
        y2 = jnp.dot(w2_ref[...], rhs_ref[...],
                     preferred_element_type=jnp.float32)
        mid_ref[...] = y2 + b2_ref[...]

        # residual add + relu; full-width lane-dense stores
        for i in range(Nb):
            out_ref[i] = jnp.maximum(mid_ref[:, i * HW:(i + 1) * HW] + x_ref[i],
                                     0.0)

    out = pl.pallas_call(
        kernel,
        out_shape=jax.ShapeDtypeStruct((N, Cout, HW), jnp.float32),
        grid_spec=pltpu.PrefetchScalarGridSpec(
            num_scalar_prefetch=0,
            grid=(N // Nb,),
            in_specs=[
                pl.BlockSpec((Nb, Cin, HW), lambda n: (n, 0, 0)),
                pl.BlockSpec((9 * Cin, HW), lambda n: (0, 0)),
                pl.BlockSpec((Cout, 9 * Cin), lambda n: (0, 0)),
                pl.BlockSpec((Cout, 1), lambda n: (0, 0)),
                pl.BlockSpec((Cout, 9 * Cout), lambda n: (0, 0)),
                pl.BlockSpec((Cout, 1), lambda n: (0, 0)),
            ],
            out_specs=pl.BlockSpec((Nb, Cout, HW), lambda n: (n, 0, 0)),
            scratch_shapes=[
                pltpu.VMEM((9 * Cin, Nb * HW), jnp.bfloat16),   # wide im2col RHS
                pltpu.VMEM((Cout, Nb * HW), jnp.float32),       # mid activations
            ],
        ),
        compiler_params=pltpu.CompilerParams(
            dimension_semantics=("parallel",),
            vmem_limit_bytes=32 * 1024 * 1024,   # well within v7x's 64 MiB part
        ),
    )(x, mask, w1m, b1, w2m, b2)

    return out.reshape(N, Cout, H, W)   # free reshape back to NCHW


def reference_forward(x, w1, bn1, w2, bn2, eps=1e-5):
    """Pure-JAX reference matching PyTorch BasicBlock (inference-mode BN)."""
    def conv(x_, w_):
        return jax.lax.conv_general_dilated(
            x_, w_, window_strides=(1, 1), padding=((1, 1), (1, 1)),
            dimension_numbers=('NCHW', 'OIHW', 'NCHW'))

    def bn(x_, p):
        g, b, m, v = p
        g, b, m, v = (t[None, :, None, None] for t in (g, b, m, v))
        return (x_ - m) / jnp.sqrt(v + eps) * g + b

    out = jax.nn.relu(bn(conv(x, w1), bn1))
    out = bn(conv(out, w2), bn2)
    return jax.nn.relu(out + x)


if __name__ == "__main__":
    key = jax.random.PRNGKey(0)
    ks = jax.random.split(key, 12)

    # inplanes == planes == 8, stride=1, no downsample; N=4 exercises the
    # Nb=2 per-step batching with an even (length-2) parallel grid.
    N, C, H, W = 4, 8, 16, 16

    x = jax.random.normal(ks[0], (N, C, H, W), jnp.float32)
    w1 = jax.random.normal(ks[1], (C, C, 3, 3), jnp.float32) * 0.1
    w2 = jax.random.normal(ks[2], (C, C, 3, 3), jnp.float32) * 0.1

    bn1 = (jax.random.uniform(ks[3], (C,), minval=0.5, maxval=1.5),   # gamma
           jax.random.normal(ks[4], (C,)) * 0.1,                      # beta
           jax.random.normal(ks[5], (C,)) * 0.1,                      # running_mean
           jax.random.uniform(ks[6], (C,), minval=0.5, maxval=1.5))   # running_var
    bn2 = (jax.random.uniform(ks[7], (C,), minval=0.5, maxval=1.5),
           jax.random.normal(ks[8], (C,)) * 0.1,
           jax.random.normal(ks[9], (C,)) * 0.1,
           jax.random.uniform(ks[10], (C,), minval=0.5, maxval=1.5))

    out = basic_block(x, w1, bn1, w2, bn2)
    out = jax.block_until_ready(out)

    ref = reference_forward(x, w1, bn1, w2, bn2)
    assert out.shape == ref.shape == (N, C, H, W)
    # bf16 matmul operands (f32 accumulate) -> tolerance relaxed vs f32 reference.
    assert jnp.allclose(out, ref, atol=5e-2, rtol=5e-2), "mismatch vs reference"

    print("KERNEL_OK")
</pallas_src>

<mosaic_0001>
module attributes {stable_mosaic.version = 11 : i64} {
  func.func @_roll_probe_kernel(%arg0: memref<8x256xf32, #tpu.memory_space<vmem>>, %arg1: memref<8x256xf32, #tpu.memory_space<vmem>>) attributes {dimension_semantics = [], scalar_prefetch = 0 : i64, scratch_operands = 0 : i64, tpu.core_type = #tpu.core_type<tc>} {
    %c0 = arith.constant 0 : index
    %c0_0 = arith.constant 0 : index
    %0 = vector.load %arg0[%c0, %c0_0] : memref<8x256xf32, #tpu.memory_space<vmem>>, vector<8x256xf32>
    %c1_i32 = arith.constant 1 : i32
    %1 = tpu.dynamic_rotate %0 by %c1_i32 dim 1 : vector<8x256xf32>, i32 -> vector<8x256xf32>
    %c0_1 = arith.constant 0 : index
    %c0_2 = arith.constant 0 : index
    %2 = vector.load %arg1[%c0_1, %c0_2] : memref<8x256xf32, #tpu.memory_space<vmem>>, vector<8x256xf32>
    tpu.vector_store %arg1[%c0_1, %c0_2], %1 {strides = array<i32>} : memref<8x256xf32, #tpu.memory_space<vmem>>, vector<8x256xf32>,
    return
  }
}

</mosaic_0001>

<bundles_post_ra>
// kernel: tpu_custom_call.1
= control target key start
LH: loop header
LB: loop body
LE: loop exit
PB: predicated region body
PF: predicated region fallthrough
CT: control target
= control target key end

     0   :  { %6 = vsyncpa [#allocation3], 0  ;;  %s137_s0 = inlined_call_operand.hbm [shape: f32[8,256], index: 0, kind: input, shape index: {}]   ;;  %s138_s1 = inlined_call_operand.hbm [shape: f32[8,256], index: 1, kind: output, shape index: {}]  }
   0x1   :  { %7 = vsyncpa [#allocation4], 0  ;;  %s100_s6 = smov [#allocation2]   ;;  %s52_s10 = scalar_lea.hbm %s137_s0, 256 }
   0x2   :  { %s14_s7 = sshll.u32 %s100_s6, 4  ;;  %p53_p0 = scmp.ne.s32.totalorder %s137_s0, %s52_s10  ;;  %s15_s7 = int_to_ptr.vmem [resolvable:$true] %s14_s7 }
   0x3   :  { %p56_p1 = scmp.lt.u32.totalorder %s52_s10, %s137_s0 }
   0x5   :  { %p58_p2 = pnand %p56_p1, %p53_p0 }
   0x7   :  { %61 = shalt.err (!%p58_p2)
}
   0x8   :  { %s62_s15 = scalar_lea.vmem %s15_s7, 256  ;;  %p67_p4 = scmp.lt.s32.totalorder %s15_s7, %s15_s7 }
   0x9   :  { %p63_p3 = scmp.ne.s32.totalorder %s15_s7, %s62_s15  ;;  %p68_p5 = scmp.lt.s32.totalorder %s62_s15, %s62_s15 }
   0xb   :  { %p69_p6 = por %p68_p5, %p67_p4 }
   0xd   :  { %p70_p7 = pnand %p69_p6, %p63_p3 }
   0xf   :  { %73 = shalt.err (!%p70_p7)
}
  0x10   :  { %17 = dma.hbm_to_vmem [thread:$0]  %s137_s0, 256, %s15_s7, [#allocation3]  }
  0x11   :  { %96 = dma.done.wait [#allocation3], 256  }
  0x12   :  { %97 = vsyncadd [#allocation3], 4294967040  ;;  %v21_v0 = vld [vmem:[#allocation2] sm:$0xff]  ;;  %s101_s18 = smov 1   ;;  %v22_v1 = vld [vmem:[#allocation2 + $0x8] sm:$0xff]  ;;  %v27_v2 = vlaneseq  ;;  %s102_s19 = smov [#allocation5]  }
  0x13   :  { %23 = vrot.lane.b32.xlu0 %v21_v0, %s101_s18  ;;  %s40_s20 = sshll.u32 %s102_s19, 4  ;;  %s41_s20 = int_to_ptr.vmem [resolvable:$true] %s40_s20 }
  0x14   :  { %v28_v3 = vand.u32 127, %v27_v2  ;;  %s74_s0 = scalar_lea.vmem %s41_s20, 256  ;;  %p79_p9 = scmp.lt.s32.totalorder %s41_s20, %s41_s20 }
  0x15   :  { %p75_p8 = scmp.ne.s32.totalorder %s41_s20, %s74_s0  ;;  %p80_p10 = scmp.lt.s32.totalorder %s74_s0, %s74_s0 }
  0x16   :  { %vm29_vm0 = vcmp.lt.s32.totalorder %v28_v3, 1 }
  0x17   :  { %25 = vrot.lane.b32.xlu0 %v22_v1, %s101_s18  ;;  %p81_p11 = por %p80_p10, %p79_p9 }
  0x19   :  { %p82_p12 = pnand %p81_p11, %p75_p8 }
  0x85   :  { %v24_v4 = vpop.permute.xlu0 %23 }
  0x89   :  { %v26_v5 = vpop.permute.xlu0 %25 }
  0x8a   :  { %v30_v6 = vsel %vm29_vm0, %v24_v4, %v26_v5  ;;  %v31_v7 = vsel %vm29_vm0, %v26_v5, %v24_v4 }
  0x8b   :  { %32 = vst [vmem:[#allocation5] sm:$0xff] %v31_v7  ;;  %33 = vst [vmem:[#allocation5 + $0x8] sm:$0xff] %v30_v6 }
  0x8c   :  { %85 = shalt.err (!%p82_p12)
}
  0x8d   :  { %s86_s23 = scalar_lea.hbm %s138_s1, 256 }
  0x8e   :  { %p87_p13 = scmp.ne.s32.totalorder %s138_s1, %s86_s23  ;;  %p90_p0 = scmp.lt.u32.totalorder %s86_s23, %s138_s1 }
  0x90   :  { %p92_p1 = pnand %p90_p0, %p87_p13 }
  0x92   :  { %95 = shalt.err (!%p92_p1)
}
  0x93   :  { %43 = dma.vmem_to_hbm [thread:$0]  %s41_s20, 256, %s138_s1, [#allocation4]  }
  0x94   :  { %98 = dma.done.wait [#allocation4], 256  }
  0x95   :  { %99 = vsyncadd [#allocation4], 4294967040 }
  0x96   :  { %47 = vsyncpa [#allocation3], 1 }
  0x97   :  { %48 = vsyncpa [#allocation4], 1 }

</bundles_post_ra>
